<compile_context>
chip_gen: v6e
topology: v6e:2x2x1
jax: 0.10.0
libtpu: 0.0.40
codegen_flags: <defaults>
</compile_context>

<pallas_src>
import functools

import jax
import jax.numpy as jnp
from jax.experimental import pallas as pl
from jax.experimental.pallas import tpu as pltpu


_INV_SQRT2 = 0.7071067811865476        # 1/sqrt(2), exact-GELU constant
_SQRT_2_OVER_PI = 0.7978845608028654   # tanh-approx GELU constant


def _gelu(g, approximate):
    if approximate:
        # tanh goes to the EUP slot (otherwise idle here) instead of the VALU.
        return 0.5 * g * (1.0 + jnp.tanh(_SQRT_2_OVER_PI * (g + 0.044715 * g * g * g)))
    # Exact erf -> parity with torch.nn.functional.gelu default.
    return 0.5 * g * (1.0 + jax.lax.erf(g * _INV_SQRT2))


def _geglu_kernel_single_k(x_ref, wv_ref, wg_ref, bv_ref, bg_ref, o_ref, *,
                           approximate):
    """dim_in handled in one K pass: no accumulator scratch, no RMW traffic."""
    x = x_ref[...]
    h = jnp.dot(x, wv_ref[...], preferred_element_type=jnp.float32)
    g = jnp.dot(x, wg_ref[...], preferred_element_type=jnp.float32)
    h = h + bv_ref[...].astype(jnp.float32)
    g = g + bg_ref[...].astype(jnp.float32)
    o_ref[...] = (h * _gelu(g, approximate)).astype(o_ref.dtype)


def _geglu_kernel_multi_k(x_ref, wv_ref, wg_ref, bv_ref, bg_ref, o_ref,
                          acc_v, acc_g, *, approximate):
    """K-tiled variant: f32 VMEM accumulators, K is the innermost grid axis."""
    k = pl.program_id(2)
    x = x_ref[...]
    dv = jnp.dot(x, wv_ref[...], preferred_element_type=jnp.float32)
    dg = jnp.dot(x, wg_ref[...], preferred_element_type=jnp.float32)

    @pl.when(k == 0)
    def _first():  # direct write: no zero fill, no first-step accumulator read
        acc_v[...] = dv
        acc_g[...] = dg

    @pl.when(k != 0)
    def _accum():
        acc_v[...] += dv
        acc_g[...] += dg

    @pl.when(k == pl.num_programs(2) - 1)
    def _finalize():
        h = acc_v[...] + bv_ref[...].astype(jnp.float32)
        g = acc_g[...] + bg_ref[...].astype(jnp.float32)
        o_ref[...] = (h * _gelu(g, approximate)).astype(o_ref.dtype)


def _round_up(x, m):
    return (x + m - 1) // m * m


def _largest_divisor(n, candidates):
    for c in candidates:
        if 0 < c <= n and n % c == 0:
            return c
    return None


def _device_default_tiles():
    kind = ""
    try:
        kind = jax.devices()[0].device_kind.lower()
    except Exception:
        pass
    if "v5 lite" in kind or "v5e" in kind or "v5litepod" in kind:
        return 512, 256, 1024       # ~roofline knee for 197 TF/s vs ~0.8 TB/s
    if "v7" in kind:
        return 1024, 512, 1024      # fits 64 MiB per-TC VMEM, keeps both TCs busy
    return 2048, 512, 1024          # v6e / unknown: push well past ~640 flops/byte


@functools.partial(jax.jit, static_argnames=("tm", "tn", "tk", "approximate"))
def geglu(x, w, b, *, tm=None, tn=None, tk=None, approximate=False):
    """GEGLU forward.

    x: (..., dim_in)
    w: (dim_in, 2*dim_out)   (nn.Linear weight, transposed)
    b: (2*dim_out,)
    returns (..., dim_out)
    """
    *lead, dim_in = x.shape
    two_dim_out = w.shape[1]
    dim_out = two_dim_out // 2

    m = 1
    for d in lead:
        m *= d
    x2d = x.reshape(m, dim_in)

    d_tm, d_tn, d_tk = _device_default_tiles()
    tm = d_tm if tm is None else tm
    tn = d_tn if tn is None else tn
    tk = d_tk if tk is None else tk

    itemsize = jnp.dtype(x.dtype).itemsize
    wsize = jnp.dtype(w.dtype).itemsize
    # Minimal sublane granule for the activation dtype (8 f32 / 16 bf16 / 32 8-bit).
    sub = max(8, 32 // itemsize)

    # ---- M tiling: never pad/copy x for M; pl.cdiv grid + dropped OOB writes.
    tm_eff = min(tm, _round_up(m, sub))

    # ---- K tiling: single pass when it fits, else a tk that divides dim_in.
    if dim_in <= 2048:
        tk_eff, k_pad = dim_in, dim_in
    else:
        tk_eff = _largest_divisor(dim_in, (2048, 1024, 512, 256, 128))
        if tk_eff is None:                      # awkward dim_in: pad K once
            tk_eff = tk
            k_pad = _round_up(dim_in, tk_eff)
        else:
            k_pad = dim_in

    # ---- N tiling: lane-dense tiles that divide the (padded) half width.
    if dim_out % 128 == 0:
        n_pad = dim_out
    else:
        n_pad = _round_up(dim_out, 256) if dim_out > 128 else 128
    tn_eff = _largest_divisor(n_pad, (tn, 512, 384, 256, 128)) or 128

    # ---- VMEM-budget-aware tile shrink (keeps v7x's 64 MiB per-TC VMEM safe).
    def _vmem_est(tm_, tn_, tk_, multi_k_):
        est = 2 * tm_ * tk_ * itemsize          # x tile, double-buffered
        est += 2 * 2 * tk_ * tn_ * wsize        # value + gate weight tiles, dbl buf
        est += 2 * tm_ * tn_ * itemsize         # out tile, dbl buf
        if multi_k_:
            est += 2 * tm_ * tn_ * 4            # two f32 accumulators
        return est

    multi_k = (k_pad // tk_eff) > 1
    budget = 48 * 1024 * 1024
    while _vmem_est(tm_eff, tn_eff, tk_eff, multi_k) > budget and tm_eff > 2 * sub:
        tm_eff = max(sub, _round_up(tm_eff // 2, sub))

    # ---- operand preparation -------------------------------------------------
    need_k_pad = (k_pad != dim_in)
    need_n_pad = (n_pad != dim_out)

    if need_k_pad:
        x2d = jnp.pad(x2d, ((0, 0), (0, k_pad - dim_in)))

    if not need_n_pad:
        # Aligned (real model) shapes: no per-half weight copies. The combined
        # weight is passed twice (same HBM buffer); the gate half is reached via
        # a block-index offset in its index_map.
        w_use = jnp.pad(w, ((0, k_pad - dim_in), (0, 0))) if need_k_pad else w
        wv_arr = wg_arr = w_use
        bv_arr = bg_arr = b.reshape(1, two_dim_out)
        gate_off = dim_out // tn_eff
    else:
        # Unaligned (small/demo) dim_out: zero-padded per-half operands.
        wv_arr = jnp.zeros((k_pad, n_pad), w.dtype).at[:dim_in, :dim_out].set(
            w[:, :dim_out])
        wg_arr = jnp.zeros((k_pad, n_pad), w.dtype).at[:dim_in, :dim_out].set(
            w[:, dim_out:])
        bv_arr = jnp.zeros((1, n_pad), b.dtype).at[0, :dim_out].set(b[:dim_out])
        bg_arr = jnp.zeros((1, n_pad), b.dtype).at[0, :dim_out].set(b[dim_out:])
        gate_off = 0

    m_blocks = pl.cdiv(m, tm_eff)
    n_blocks = n_pad // tn_eff
    k_blocks = k_pad // tk_eff
    grid = (m_blocks, n_blocks, k_blocks)

    cost = pl.CostEstimate(
        flops=2 * m * k_pad * 2 * n_pad,
        transcendentals=m * n_pad,
        bytes_accessed=(m * k_pad * itemsize * n_blocks          # x re-streamed / N block
                        + k_pad * 2 * n_pad * wsize * m_blocks   # w re-streamed / M block
                        + 2 * n_pad * jnp.dtype(b.dtype).itemsize * m_blocks
                        + m * n_pad * itemsize),
    )

    if multi_k:
        kernel = functools.partial(_geglu_kernel_multi_k, approximate=approximate)
        scratch = [pltpu.VMEM((tm_eff, tn_eff), jnp.float32),
                   pltpu.VMEM((tm_eff, tn_eff), jnp.float32)]
    else:
        kernel = functools.partial(_geglu_kernel_single_k, approximate=approximate)
        scratch = []

    vmem_limit = int(min(64 * 1024 * 1024,
                         max(32 * 1024 * 1024,
                             2 * _vmem_est(tm_eff, tn_eff, tk_eff, multi_k))))

    out2d = pl.pallas_call(
        kernel,
        out_shape=jax.ShapeDtypeStruct((m, n_pad), x.dtype),
        grid_spec=pltpu.PrefetchScalarGridSpec(
            num_scalar_prefetch=0,
            grid=grid,
            in_specs=[
                pl.BlockSpec((tm_eff, tk_eff), lambda i, j, k: (i, k)),
                pl.BlockSpec((tk_eff, tn_eff), lambda i, j, k: (k, j)),
                pl.BlockSpec((tk_eff, tn_eff),
                             lambda i, j, k: (k, j + gate_off)),
                pl.BlockSpec((1, tn_eff), lambda i, j, k: (0, j)),
                pl.BlockSpec((1, tn_eff), lambda i, j, k: (0, j + gate_off)),
            ],
            out_specs=pl.BlockSpec((tm_eff, tn_eff), lambda i, j, k: (i, j)),
            scratch_shapes=scratch,
        ),
        compiler_params=pltpu.CompilerParams(
            dimension_semantics=("parallel", "parallel", "arbitrary"),
            vmem_limit_bytes=vmem_limit,
        ),
        cost_estimate=cost,
    )(x2d, wv_arr, wg_arr, bv_arr, bg_arr)

    if n_pad != dim_out:
        out2d = out2d[:, :dim_out]
    return out2d.reshape(*lead, dim_out)


def _reference_geglu(x, w, b):
    proj = jnp.dot(x, w) + b
    h, g = jnp.split(proj, 2, axis=-1)
    return h * jax.nn.gelu(g, approximate=False)


if __name__ == "__main__":
    # Small shapes consistent with the module: batch=2, seq=8, dim_in=32, dim_out=32
    batch, seq, dim_in, dim_out = 2, 8, 32, 32

    key = jax.random.PRNGKey(0)
    kx, kw, kb = jax.random.split(key, 3)

    x = jax.random.normal(kx, (batch, seq, dim_in), dtype=jnp.float32)
    # Deterministic synthetic nn.Linear(dim_in, 2*dim_out) parameters
    # (uniform(-1/sqrt(dim_in), 1/sqrt(dim_in)) like PyTorch's default init).
    bound = 1.0 / (dim_in ** 0.5)
    w = jax.random.uniform(kw, (dim_in, 2 * dim_out), jnp.float32, -bound, bound)
    b = jax.random.uniform(kb, (2 * dim_out,), jnp.float32, -bound, bound)

    out = jax.block_until_ready(geglu(x, w, b))

    ref = _reference_geglu(x, w, b)
    assert out.shape == (batch, seq, dim_out)
    assert jnp.allclose(out, ref, atol=1e-5, rtol=1e-5), "mismatch vs reference"

    print("KERNEL_OK")
</pallas_src>

<mosaic_0001>
module attributes {stable_mosaic.version = 11 : i64} {
  func.func @_geglu_kernel_single_k(%arg0: i32, %arg1: i32, %arg2: i32, %arg3: memref<16x32xf32, #tpu.memory_space<vmem>>, %arg4: memref<32x128xf32, #tpu.memory_space<vmem>>, %arg5: memref<32x128xf32, #tpu.memory_space<vmem>>, %arg6: memref<1x128xf32, #tpu.memory_space<vmem>>, %arg7: memref<1x128xf32, #tpu.memory_space<vmem>>, %arg8: memref<16x128xf32, #tpu.memory_space<vmem>>) attributes {dimension_semantics = [#tpu.dimension_semantics<parallel>, #tpu.dimension_semantics<parallel>, #tpu.dimension_semantics<arbitrary>], iteration_bounds = array<i64: 1, 1, 1>, scalar_prefetch = 0 : i64, scratch_operands = 0 : i64, tpu.core_type = #tpu.core_type<tc>, window_params = [{transform_indices = @transform_0, window_bounds = array<i64: 16, 32>}, {transform_indices = @transform_1, window_bounds = array<i64: 32, 128>}, {transform_indices = @transform_2, window_bounds = array<i64: 32, 128>}, {transform_indices = @transform_3, window_bounds = array<i64: 1, 128>}, {transform_indices = @transform_4, window_bounds = array<i64: 1, 128>}, {transform_indices = @transform_5, window_bounds = array<i64: 16, 128>}]} {
    %c0 = arith.constant 0 : index
    %c0_0 = arith.constant 0 : index
    %0 = vector.load %arg3[%c0, %c0_0] : memref<16x32xf32, #tpu.memory_space<vmem>>, vector<16x32xf32>
    %c0_1 = arith.constant 0 : index
    %c0_2 = arith.constant 0 : index
    %1 = vector.load %arg4[%c0_1, %c0_2] : memref<32x128xf32, #tpu.memory_space<vmem>>, vector<32x128xf32>
    %cst = arith.constant dense<0.000000e+00> : vector<16x128xf32>
    %2 = tpu.matmul %0, %1, %cst {dimension_numbers = #tpu.dot_dimension_numbers<[1], [0], [0], [1], [0, 0, 1, 1], [], []>} : vector<16x32xf32>, vector<32x128xf32>, vector<16x128xf32> -> vector<16x128xf32>
    %c0_3 = arith.constant 0 : index
    %c0_4 = arith.constant 0 : index
    %3 = vector.load %arg5[%c0_3, %c0_4] : memref<32x128xf32, #tpu.memory_space<vmem>>, vector<32x128xf32>
    %cst_5 = arith.constant dense<0.000000e+00> : vector<16x128xf32>
    %4 = tpu.matmul %0, %3, %cst_5 {dimension_numbers = #tpu.dot_dimension_numbers<[1], [0], [0], [1], [0, 0, 1, 1], [], []>} : vector<16x32xf32>, vector<32x128xf32>, vector<16x128xf32> -> vector<16x128xf32>
    %c0_6 = arith.constant 0 : index
    %c0_7 = arith.constant 0 : index
    %5 = vector.load %arg6[%c0_6, %c0_7] : memref<1x128xf32, #tpu.memory_space<vmem>>, vector<1x128xf32>
    %6 = vector.broadcast %5 : vector<1x128xf32> to vector<16x128xf32>
    %7 = arith.addf %2, %6 : vector<16x128xf32>
    %c0_8 = arith.constant 0 : index
    %c0_9 = arith.constant 0 : index
    %8 = vector.load %arg7[%c0_8, %c0_9] : memref<1x128xf32, #tpu.memory_space<vmem>>, vector<1x128xf32>
    %9 = vector.broadcast %8 : vector<1x128xf32> to vector<16x128xf32>
    %10 = arith.addf %4, %9 : vector<16x128xf32>
    %cst_10 = arith.constant 5.000000e-01 : f32
    %11 = vector.broadcast %cst_10 : f32 to vector<16x128xf32>
    %12 = arith.mulf %11, %10 : vector<16x128xf32>
    %cst_11 = arith.constant 0.707106769 : f32
    %13 = vector.broadcast %cst_11 : f32 to vector<16x128xf32>
    %14 = arith.mulf %10, %13 : vector<16x128xf32>
    %15 = math.erf %14 : vector<16x128xf32>
    %cst_12 = arith.constant 1.000000e+00 : f32
    %16 = vector.broadcast %cst_12 : f32 to vector<16x128xf32>
    %17 = arith.addf %16, %15 : vector<16x128xf32>
    %18 = arith.mulf %12, %17 : vector<16x128xf32>
    %19 = arith.mulf %7, %18 : vector<16x128xf32>
    %c0_13 = arith.constant 0 : index
    %c0_14 = arith.constant 0 : index
    %20 = vector.load %arg8[%c0_13, %c0_14] : memref<16x128xf32, #tpu.memory_space<vmem>>, vector<16x128xf32>
    tpu.vector_store %arg8[%c0_13, %c0_14], %19 {strides = array<i32>} : memref<16x128xf32, #tpu.memory_space<vmem>>, vector<16x128xf32>,
    return
  }
  func.func @transform_0(%arg0: i32, %arg1: i32, %arg2: i32) -> (i32, i32) {
    %c0_i32 = arith.constant 0 : i32
    return %arg0, %arg2 : i32, i32
  }
  func.func @transform_1(%arg0: i32, %arg1: i32, %arg2: i32) -> (i32, i32) {
    %c0_i32 = arith.constant 0 : i32
    return %arg2, %arg1 : i32, i32
  }
  func.func @transform_2(%arg0: i32, %arg1: i32, %arg2: i32) -> (i32, i32) {
    %c0_i32 = arith.constant 0 : i32
    %0 = arith.addi %arg1, %c0_i32 : i32
    %c0_i32_0 = arith.constant 0 : i32
    return %arg2, %0 : i32, i32
  }
  func.func @transform_3(%arg0: i32, %arg1: i32, %arg2: i32) -> (i32, i32) {
    %c0_i32 = arith.constant 0 : i32
    %c0_i32_0 = arith.constant 0 : i32
    return %c0_i32, %arg1 : i32, i32
  }
  func.func @transform_4(%arg0: i32, %arg1: i32, %arg2: i32) -> (i32, i32) {
    %c0_i32 = arith.constant 0 : i32
    %0 = arith.addi %arg1, %c0_i32 : i32
    %c0_i32_0 = arith.constant 0 : i32
    %c0_i32_1 = arith.constant 0 : i32
    return %c0_i32_0, %0 : i32, i32
  }
  func.func @transform_5(%arg0: i32, %arg1: i32, %arg2: i32) -> (i32, i32) {
    %c0_i32 = arith.constant 0 : i32
    return %arg0, %arg1 : i32, i32
  }
}

</mosaic_0001>

<bundles_post_ra>
// kernel: geglu.1
= control target key start
LH: loop header
LB: loop body
LE: loop exit
PB: predicated region body
PF: predicated region fallthrough
CT: control target
= control target key end

     0   :  { %vm37_vm0 = vcmask 261120   ;;  %s339_s2 = inlined_call_operand.vmem [shape: f32[32,128], index: 2, kind: input, shape index: {}]   ;;  %s340_s0 = inlined_call_operand.vmem [shape: f32[16,32], index: 0, kind: input, shape index: {}]   ;;  %s341_s1 = inlined_call_operand.vmem [shape: f32[32,128], index: 1, kind: input, shape index: {}]   ;;  %s342_s4 = inlined_call_operand.vmem [shape: f32[1,128], index: 4, kind: input, shape index: {}]   ;;  %s343_s3 = inlined_call_operand.vmem [shape: f32[1,128], index: 3, kind: input, shape index: {}]   ;;  %s344_s5 = inlined_call_operand.vmem [shape: f32[16,128], index: 5, kind: output, shape index: {}]  }
   0x1   :  { %v29_v0 = vld [vmem:[%s339_s2 + $0x18] sm:$0xff]  ;;  %v28_v1 = vld [vmem:[%s339_s2 + $0x10] sm:$0xff]  ;;  %v20_v2 = vld [vmem:[%s340_s0] sm:$0xff] }
   0x2   :  { %248 = vmatprep.subr.mxu1 %v29_v0  ;;  %v27_v3 = vld [vmem:[%s339_s2 + $0x8] sm:$0xff]  ;;  %256 = vmatprep.mubr.msk.f32.mxu1 %vm37_vm0, %v20_v2  ;;  %v25_v4 = vld [vmem:[%s341_s1 + $0x18] sm:$0xff]  ;;  %v24_v5 = vld [vmem:[%s341_s1 + $0x10] sm:$0xff] }
   0x3   :  { %249 = vmatpush3.msra.mxu1 %v29_v0  ;;  %237 = vmatprep.subr.mxu0 %v25_v4  ;;  %v26_v6 = vld [vmem:[%s339_s2] sm:$0xff]  ;;  %v23_v7 = vld [vmem:[%s341_s1 + $0x8] sm:$0xff] }
   0x4   :  { %250 = vmatprep.subr.mxu1 %v28_v1  ;;  %238 = vmatpush3.msra.mxu0 %v25_v4  ;;  %v21_v8 = vld [vmem:[%s340_s0 + $0x8] sm:$0xff]  ;;  %v22_v9 = vld [vmem:[%s341_s1] sm:$0xff] }
   0x5   :  { %251 = vmatpush3.msra.mxu1 %v28_v1  ;;  %239 = vmatprep.subr.mxu0 %v24_v5  ;;  %v222_v10 = vld [vmem:[%s342_s4] ss:$0 sm:$0xff] }
   0x6   :  { %252 = vmatprep.subr.mxu1 %v27_v3  ;;  %240 = vmatpush3.msra.mxu0 %v24_v5  ;;  %v219_v18 = vld [vmem:[%s343_s3] ss:$0 sm:$0xff] }
   0x7   :  { %253 = vmatpush3.msra.mxu1 %v27_v3  ;;  %241 = vmatprep.subr.mxu0 %v23_v7 }
   0x8   :  { %254 = vmatprep.subr.mxu1 %v26_v6  ;;  %242 = vmatpush3.msra.mxu0 %v23_v7 }
   0x9   :  { %255 = vmatpush3.msra.mxu1 %v26_v6  ;;  %243 = vmatprep.subr.mxu0 %v22_v9 }
   0xa   :  { %257 = vmatmul.mubr.msk.f32.vlgmr.msra.gmra.mxu1 %vm37_vm0, %v21_v8  ;;  %244 = vmatpush3.msra.mxu0 %v22_v9 }
   0xb   :  { %245 = vmatprep.mubr.msk.f32.mxu0 %vm37_vm0, %v20_v2 }
   0xc   :  { %246 = vmatmul.mubr.msk.f32.vlgmr.msra.gmra.mxu0 %vm37_vm0, %v21_v8 }
  0xca   :  { %v258_v11 = vpop.f32.mrf.mxu1 }
  0xcb   :  { %v198_v12 = vadd.f32 %v258_v11, %v222_v10 }
  0xcc   :  { %v192_v13 = vpop.f32.mrf.mxu1  ;;  %v247_v17 = vpop.f32.mrf.mxu0 }
  0xcd   :  { %v204_v14 = vmul.f32 0.70710677, %v198_v12  ;;  %v193_v15 = vadd.f32 %v222_v10, %v192_v13  ;;  %v202_v20 = vmul.f32 0.5, %v198_v12  ;;  %v116_v21 = vadd.f32 %v247_v17, %v219_v18 }
  0xce   :  { %v110_v24 = vpop.f32.mrf.mxu0 }
  0xcf   :  { %259 = verf.f32 %v204_v14  ;;  %v203_v16 = vmul.f32 0.70710677, %v193_v15  ;;  %v201_v25 = vmul.f32 0.5, %v193_v15  ;;  %v111_v29 = vadd.f32 %v219_v18, %v110_v24 }
  0xd1   :  { %261 = verf.f32 %v203_v16 }
  0xdc   :  { %v260_v19 = vpop.eup %259 }
  0xdd   :  { %v208_v22 = vadd.f32 1.0, %v260_v19 }
  0xde   :  { %v262_v23 = vpop.eup %261 }
  0xdf   :  { %v210_v26 = vmul.f32 %v208_v22, %v202_v20  ;;  %v207_v27 = vadd.f32 1.0, %v262_v23 }
  0xe1   :  { %v212_v28 = vmul.f32 %v210_v26, %v116_v21  ;;  %v209_v30 = vmul.f32 %v207_v27, %v201_v25 }
  0xe3   :  { %214 = vst [vmem:[%s344_s5 + $0x8] sm:$0xff] %v212_v28  ;;  %v211_v31 = vmul.f32 %v209_v30, %v111_v29 }
  0xe5   :  { %213 = vst [vmem:[%s344_s5] sm:$0xff] %v211_v31 }

</bundles_post_ra>
